<compile_context>
chip_gen: v7x
topology: tpu7x:2x2x1
jax: 0.10.0
libtpu: 0.0.40
codegen_flags: <defaults>
</compile_context>

<pallas_src>
import jax
import jax.numpy as jnp
from jax.experimental import pallas as pl
from jax.experimental.pallas import tpu as pltpu

# torchvision rgb_to_grayscale weights
_RW, _GW, _BW = 0.2989, 0.587, 0.114

_LANE = 128
_SUBLANE = 8
# 512 rows * 128 lanes * 3 ch * 4 B = 768 KiB per buffer; with double-buffered
# in+out plus ~15 f32 temporaries/pixel this stays well under the default
# scoped VMEM on v5e (16 MiB) and comfortably inside v7x's 64 MiB physical VMEM.
_MAX_TILE_ROWS = 512


def _round_up(x, m):
    return ((x + m - 1) // m) * m


def _gray(r, g, b):
    return _RW * r + _GW * g + _BW * b


def _rgb2hsv(r, g, b):
    # Mirrors torchvision.transforms.functional_tensor._rgb2hsv, with the
    # divisions replaced by approx reciprocals (EUP slot is otherwise idle)
    # and the redundant second modulo removed.
    maxc = jnp.maximum(jnp.maximum(r, g), b)
    minc = jnp.minimum(jnp.minimum(r, g), b)
    eqc = maxc == minc
    cr = maxc - minc
    ones = jnp.ones_like(maxc)

    inv_maxc = pl.reciprocal(jnp.where(eqc, ones, maxc), approx=True)
    s = cr * inv_maxc

    inv_cr = pl.reciprocal(jnp.where(eqc, ones, cr), approx=True)
    rc = (maxc - r) * inv_cr
    gc = (maxc - g) * inv_cr
    bc = (maxc - b) * inv_cr

    is_r = maxc == r
    is_g = (maxc == g) & (~is_r)
    is_b = (~is_r) & (maxc != g)
    hr = is_r.astype(r.dtype) * (bc - gc)
    hg = is_g.astype(r.dtype) * (2.0 + rc - bc)
    hb = is_b.astype(r.dtype) * (4.0 + gc - rc)

    h_raw = hr + hg + hb                      # in (-1, 5]
    h_raw = jnp.where(h_raw < 0.0, h_raw + 6.0, h_raw)   # cheap exact mod-6
    h = h_raw * (1.0 / 6.0)                   # in [0, 1)
    return h, s, maxc


def _hsv2rgb(h, s, v):
    # Mirrors torchvision.transforms.functional_tensor._hsv2rgb, but keeps the
    # sector index in float (no i32 cast / integer %6) and computes the six
    # sector masks once, reusing them across r, g, b.
    h6 = h * 6.0
    i_f = jnp.clip(jnp.floor(h6), 0.0, 5.0)   # sector 0..5
    f = h6 - i_f

    sv = s * v
    p = jnp.clip(v - sv, 0.0, 1.0)                # v * (1 - s)
    q = jnp.clip(v - sv * f, 0.0, 1.0)            # v * (1 - s*f)
    t = jnp.clip(v - sv * (1.0 - f), 0.0, 1.0)    # v * (1 - s*(1-f))

    dt = h.dtype
    m0 = (i_f == 0.0).astype(dt)
    m1 = (i_f == 1.0).astype(dt)
    m2 = (i_f == 2.0).astype(dt)
    m3 = (i_f == 3.0).astype(dt)
    m4 = (i_f == 4.0).astype(dt)
    m5 = (i_f == 5.0).astype(dt)

    r = (m0 + m5) * v + m1 * q + (m2 + m3) * p + m4 * t
    g = (m1 + m2) * v + m0 * t + m3 * q + (m4 + m5) * p
    b = (m4 + m5) * v + (m0 + m1) * p + (m2 + m3) * t
    return r, g, b


def _color_jitter_kernel(factors_ref, mean_ref, x_ref, o_ref):
    b_idx = pl.program_id(0)

    bf = factors_ref[0]   # brightness factor
    cf = factors_ref[1]   # contrast factor
    sf = factors_ref[2]   # saturation factor
    hf = factors_ref[3]   # hue shift
    mean = mean_ref[b_idx]  # per-image contrast mean (precomputed in wrapper)

    r = x_ref[0, 0, :, :]
    g = x_ref[0, 1, :, :]
    b = x_ref[0, 2, :, :]

    # --- brightness: blend(img, 0, bf) = clamp(bf * img, 0, 1)
    r = jnp.clip(r * bf, 0.0, 1.0)
    g = jnp.clip(g * bf, 0.0, 1.0)
    b = jnp.clip(b * bf, 0.0, 1.0)

    # --- contrast: blend(img, mean(grayscale(img)), cf) with precomputed mean
    off_c = (1.0 - cf) * mean
    r = jnp.clip(cf * r + off_c, 0.0, 1.0)
    g = jnp.clip(cf * g + off_c, 0.0, 1.0)
    b = jnp.clip(cf * b + off_c, 0.0, 1.0)

    # --- saturation: blend(img, grayscale(img), sf)  (per-pixel gray)
    gray = _gray(r, g, b)
    one_m_sf = 1.0 - sf
    r = jnp.clip(sf * r + one_m_sf * gray, 0.0, 1.0)
    g = jnp.clip(sf * g + one_m_sf * gray, 0.0, 1.0)
    b = jnp.clip(sf * b + one_m_sf * gray, 0.0, 1.0)

    # --- hue: RGB -> HSV, shift h (mod 1), HSV -> RGB
    h, s, v = _rgb2hsv(r, g, b)
    h = h + hf                                # in [-0.5, 1.5)
    h = jnp.where(h < 0.0, h + 1.0, h)
    h = jnp.where(h >= 1.0, h - 1.0, h)       # cheap exact mod-1 for this range
    r, g, b = _hsv2rgb(h, s, v)

    o_ref[0, 0, :, :] = r
    o_ref[0, 1, :, :] = g
    o_ref[0, 2, :, :] = b


def random_color_jitter(imgs, factors):
    """imgs: (B, 3, H, W) float32 in [0,1]; factors: (4,) float32 [bf, cf, sf, hue]."""
    B, C, H, W = imgs.shape
    assert C == 3, "ColorJitter expects RGB (3-channel) images"
    HW = H * W

    x = imgs.reshape(B, 3, HW).astype(jnp.float32)
    factors = factors.astype(jnp.float32)

    # Per-image contrast mean = mean over H*W of grayscale(brightness-adjusted
    # image).  Computed in the wrapper so the kernel can be tiled spatially.
    bf = factors[0]
    xb = jnp.clip(x * bf, 0.0, 1.0)
    gray = _RW * xb[:, 0, :] + _GW * xb[:, 1, :] + _BW * xb[:, 2, :]
    means = jnp.mean(gray, axis=-1).astype(jnp.float32)  # (B,)

    # Lane-dense layout: pad H*W to n_rows_p * 128 and view as (B,3,n_rows_p,128).
    n_rows = pl.cdiv(HW, _LANE)
    tile_rows = min(_round_up(n_rows, _SUBLANE), _MAX_TILE_ROWS)
    n_rows_p = _round_up(n_rows, tile_rows)
    hw_pad = n_rows_p * _LANE

    x_pad = jnp.pad(x, ((0, 0), (0, 0), (0, hw_pad - HW)))
    x4 = x_pad.reshape(B, 3, n_rows_p, _LANE)
    n_tiles = n_rows_p // tile_rows

    grid_spec = pltpu.PrefetchScalarGridSpec(
        num_scalar_prefetch=0,
        grid=(B, n_tiles),
        in_specs=[
            pl.BlockSpec(memory_space=pltpu.MemorySpace.SMEM),            # factors (4,)
            pl.BlockSpec(memory_space=pltpu.MemorySpace.SMEM),            # means (B,)
            pl.BlockSpec((1, 3, tile_rows, _LANE), lambda i, t: (i, 0, t, 0)),
        ],
        out_specs=pl.BlockSpec((1, 3, tile_rows, _LANE), lambda i, t: (i, 0, t, 0)),
    )

    out4 = pl.pallas_call(
        _color_jitter_kernel,
        out_shape=jax.ShapeDtypeStruct((B, 3, n_rows_p, _LANE), jnp.float32),
        grid_spec=grid_spec,
        compiler_params=pltpu.CompilerParams(
            dimension_semantics=("parallel", "parallel")),
    )(factors, means, x4)

    return out4.reshape(B, 3, hw_pad)[:, :, :HW].reshape(B, 3, H, W)


def sample_jitter_factors(key, brightness, contrast, saturation, hue):
    """Deterministic stand-in for ColorJitter.get_params (one sample per call)."""
    kb, kc, ks, kh = jax.random.split(key, 4)
    bf = jax.random.uniform(kb, (), minval=max(0.0, 1.0 - brightness),
                            maxval=1.0 + brightness)
    cf = jax.random.uniform(kc, (), minval=max(0.0, 1.0 - contrast),
                            maxval=1.0 + contrast)
    sf = jax.random.uniform(ks, (), minval=max(0.0, 1.0 - saturation),
                            maxval=1.0 + saturation)
    hf = jax.random.uniform(kh, (), minval=-hue, maxval=hue)
    return jnp.stack([bf, cf, sf, hf]).astype(jnp.float32)


if __name__ == "__main__":
    key = jax.random.PRNGKey(0)
    k_img, k_fac = jax.random.split(key, 2)

    B, C, H, W = 2, 3, 16, 16
    imgs = jax.random.uniform(k_img, (B, C, H, W), dtype=jnp.float32)

    # RandomColorJitter(brightness=0.4, contrast=0.4, saturation=0.4, hue=0.1)
    factors = sample_jitter_factors(k_fac, 0.4, 0.4, 0.4, 0.1)

    out = random_color_jitter(imgs, factors)
    jax.block_until_ready(out)

    assert out.shape == imgs.shape and out.dtype == jnp.float32
    print("KERNEL_OK")
</pallas_src>

<mosaic_0001>
module attributes {stable_mosaic.version = 11 : i64} {
  func.func @_color_jitter_kernel(%arg0: i32, %arg1: i32, %arg2: memref<4xf32, #tpu.memory_space<smem>>, %arg3: memref<2xf32, #tpu.memory_space<smem>>, %arg4: memref<1x3x8x128xf32, #tpu.memory_space<vmem>>, %arg5: memref<1x3x8x128xf32, #tpu.memory_space<vmem>>) attributes {dimension_semantics = [#tpu.dimension_semantics<parallel>, #tpu.dimension_semantics<parallel>], iteration_bounds = array<i64: 2, 1>, scalar_prefetch = 0 : i64, scratch_operands = 0 : i64, tpu.core_type = #tpu.core_type<tc>, window_params = [{transform_indices = @transform_0, window_bounds = array<i64: 4>}, {transform_indices = @transform_1, window_bounds = array<i64: 2>}, {transform_indices = @transform_2, window_bounds = array<i64: 1, 3, 8, 128>}, {transform_indices = @transform_3, window_bounds = array<i64: 1, 3, 8, 128>}]} {
    %c0 = arith.constant 0 : index
    %0 = memref.load %arg2[%c0] : memref<4xf32, #tpu.memory_space<smem>>
    %c1 = arith.constant 1 : index
    %1 = memref.load %arg2[%c1] : memref<4xf32, #tpu.memory_space<smem>>
    %c2 = arith.constant 2 : index
    %2 = memref.load %arg2[%c2] : memref<4xf32, #tpu.memory_space<smem>>
    %c3 = arith.constant 3 : index
    %3 = memref.load %arg2[%c3] : memref<4xf32, #tpu.memory_space<smem>>
    %4 = arith.index_cast %arg0 : i32 to index
    %5 = memref.load %arg3[%4] : memref<2xf32, #tpu.memory_space<smem>>
    %c0_0 = arith.constant 0 : index
    %c0_1 = arith.constant 0 : index
    %c0_2 = arith.constant 0 : index
    %c0_3 = arith.constant 0 : index
    %6 = vector.load %arg4[%c0_0, %c0_1, %c0_2, %c0_3] : memref<1x3x8x128xf32, #tpu.memory_space<vmem>>, vector<1x1x8x128xf32>
    %7 = vector.shape_cast %6 : vector<1x1x8x128xf32> to vector<8x128xf32>
    %c0_4 = arith.constant 0 : index
    %c1_5 = arith.constant 1 : index
    %c0_6 = arith.constant 0 : index
    %c0_7 = arith.constant 0 : index
    %8 = vector.load %arg4[%c0_4, %c1_5, %c0_6, %c0_7] : memref<1x3x8x128xf32, #tpu.memory_space<vmem>>, vector<1x1x8x128xf32>
    %9 = vector.shape_cast %8 : vector<1x1x8x128xf32> to vector<8x128xf32>
    %c0_8 = arith.constant 0 : index
    %c2_9 = arith.constant 2 : index
    %c0_10 = arith.constant 0 : index
    %c0_11 = arith.constant 0 : index
    %10 = vector.load %arg4[%c0_8, %c2_9, %c0_10, %c0_11] : memref<1x3x8x128xf32, #tpu.memory_space<vmem>>, vector<1x1x8x128xf32>
    %11 = vector.shape_cast %10 : vector<1x1x8x128xf32> to vector<8x128xf32>
    %12 = vector.broadcast %0 : f32 to vector<8x128xf32>
    %13 = arith.mulf %7, %12 : vector<8x128xf32>
    %cst = arith.constant 0.000000e+00 : f32
    %cst_12 = arith.constant 1.000000e+00 : f32
    %14 = vector.broadcast %cst : f32 to vector<8x128xf32>
    %15 = arith.maximumf %14, %13 : vector<8x128xf32>
    %16 = vector.broadcast %cst_12 : f32 to vector<8x128xf32>
    %17 = arith.minimumf %16, %15 : vector<8x128xf32>
    %18 = vector.broadcast %0 : f32 to vector<8x128xf32>
    %19 = arith.mulf %9, %18 : vector<8x128xf32>
    %cst_13 = arith.constant 0.000000e+00 : f32
    %cst_14 = arith.constant 1.000000e+00 : f32
    %20 = vector.broadcast %cst_13 : f32 to vector<8x128xf32>
    %21 = arith.maximumf %20, %19 : vector<8x128xf32>
    %22 = vector.broadcast %cst_14 : f32 to vector<8x128xf32>
    %23 = arith.minimumf %22, %21 : vector<8x128xf32>
    %24 = vector.broadcast %0 : f32 to vector<8x128xf32>
    %25 = arith.mulf %11, %24 : vector<8x128xf32>
    %cst_15 = arith.constant 0.000000e+00 : f32
    %cst_16 = arith.constant 1.000000e+00 : f32
    %26 = vector.broadcast %cst_15 : f32 to vector<8x128xf32>
    %27 = arith.maximumf %26, %25 : vector<8x128xf32>
    %28 = vector.broadcast %cst_16 : f32 to vector<8x128xf32>
    %29 = arith.minimumf %28, %27 : vector<8x128xf32>
    %cst_17 = arith.constant 1.000000e+00 : f32
    %30 = arith.subf %cst_17, %1 : f32
    %31 = arith.mulf %30, %5 : f32
    %32 = vector.broadcast %1 : f32 to vector<8x128xf32>
    %33 = arith.mulf %32, %17 : vector<8x128xf32>
    %34 = vector.broadcast %31 : f32 to vector<8x128xf32>
    %35 = arith.addf %33, %34 : vector<8x128xf32>
    %cst_18 = arith.constant 0.000000e+00 : f32
    %cst_19 = arith.constant 1.000000e+00 : f32
    %36 = vector.broadcast %cst_18 : f32 to vector<8x128xf32>
    %37 = arith.maximumf %36, %35 : vector<8x128xf32>
    %38 = vector.broadcast %cst_19 : f32 to vector<8x128xf32>
    %39 = arith.minimumf %38, %37 : vector<8x128xf32>
    %40 = vector.broadcast %1 : f32 to vector<8x128xf32>
    %41 = arith.mulf %40, %23 : vector<8x128xf32>
    %42 = vector.broadcast %31 : f32 to vector<8x128xf32>
    %43 = arith.addf %41, %42 : vector<8x128xf32>
    %cst_20 = arith.constant 0.000000e+00 : f32
    %cst_21 = arith.constant 1.000000e+00 : f32
    %44 = vector.broadcast %cst_20 : f32 to vector<8x128xf32>
    %45 = arith.maximumf %44, %43 : vector<8x128xf32>
    %46 = vector.broadcast %cst_21 : f32 to vector<8x128xf32>
    %47 = arith.minimumf %46, %45 : vector<8x128xf32>
    %48 = vector.broadcast %1 : f32 to vector<8x128xf32>
    %49 = arith.mulf %48, %29 : vector<8x128xf32>
    %50 = vector.broadcast %31 : f32 to vector<8x128xf32>
    %51 = arith.addf %49, %50 : vector<8x128xf32>
    %cst_22 = arith.constant 0.000000e+00 : f32
    %cst_23 = arith.constant 1.000000e+00 : f32
    %52 = vector.broadcast %cst_22 : f32 to vector<8x128xf32>
    %53 = arith.maximumf %52, %51 : vector<8x128xf32>
    %54 = vector.broadcast %cst_23 : f32 to vector<8x128xf32>
    %55 = arith.minimumf %54, %53 : vector<8x128xf32>
    %cst_24 = arith.constant 2.989000e-01 : f32
    %56 = vector.broadcast %cst_24 : f32 to vector<8x128xf32>
    %57 = arith.mulf %56, %39 : vector<8x128xf32>
    %cst_25 = arith.constant 5.870000e-01 : f32
    %58 = vector.broadcast %cst_25 : f32 to vector<8x128xf32>
    %59 = arith.mulf %58, %47 : vector<8x128xf32>
    %60 = arith.addf %57, %59 : vector<8x128xf32>
    %cst_26 = arith.constant 1.140000e-01 : f32
    %61 = vector.broadcast %cst_26 : f32 to vector<8x128xf32>
    %62 = arith.mulf %61, %55 : vector<8x128xf32>
    %63 = arith.addf %60, %62 : vector<8x128xf32>
    %cst_27 = arith.constant 1.000000e+00 : f32
    %64 = arith.subf %cst_27, %2 : f32
    %65 = vector.broadcast %2 : f32 to vector<8x128xf32>
    %66 = arith.mulf %65, %39 : vector<8x128xf32>
    %67 = vector.broadcast %64 : f32 to vector<8x128xf32>
    %68 = arith.mulf %67, %63 : vector<8x128xf32>
    %69 = arith.addf %66, %68 : vector<8x128xf32>
    %cst_28 = arith.constant 0.000000e+00 : f32
    %cst_29 = arith.constant 1.000000e+00 : f32
    %70 = vector.broadcast %cst_28 : f32 to vector<8x128xf32>
    %71 = arith.maximumf %70, %69 : vector<8x128xf32>
    %72 = vector.broadcast %cst_29 : f32 to vector<8x128xf32>
    %73 = arith.minimumf %72, %71 : vector<8x128xf32>
    %74 = vector.broadcast %2 : f32 to vector<8x128xf32>
    %75 = arith.mulf %74, %47 : vector<8x128xf32>
    %76 = vector.broadcast %64 : f32 to vector<8x128xf32>
    %77 = arith.mulf %76, %63 : vector<8x128xf32>
    %78 = arith.addf %75, %77 : vector<8x128xf32>
    %cst_30 = arith.constant 0.000000e+00 : f32
    %cst_31 = arith.constant 1.000000e+00 : f32
    %79 = vector.broadcast %cst_30 : f32 to vector<8x128xf32>
    %80 = arith.maximumf %79, %78 : vector<8x128xf32>
    %81 = vector.broadcast %cst_31 : f32 to vector<8x128xf32>
    %82 = arith.minimumf %81, %80 : vector<8x128xf32>
    %83 = vector.broadcast %2 : f32 to vector<8x128xf32>
    %84 = arith.mulf %83, %55 : vector<8x128xf32>
    %85 = vector.broadcast %64 : f32 to vector<8x128xf32>
    %86 = arith.mulf %85, %63 : vector<8x128xf32>
    %87 = arith.addf %84, %86 : vector<8x128xf32>
    %cst_32 = arith.constant 0.000000e+00 : f32
    %cst_33 = arith.constant 1.000000e+00 : f32
    %88 = vector.broadcast %cst_32 : f32 to vector<8x128xf32>
    %89 = arith.maximumf %88, %87 : vector<8x128xf32>
    %90 = vector.broadcast %cst_33 : f32 to vector<8x128xf32>
    %91 = arith.minimumf %90, %89 : vector<8x128xf32>
    %92 = arith.maximumf %73, %82 : vector<8x128xf32>
    %93 = arith.maximumf %92, %91 : vector<8x128xf32>
    %94 = arith.minimumf %73, %82 : vector<8x128xf32>
    %95 = arith.minimumf %94, %91 : vector<8x128xf32>
    %96 = arith.cmpf oeq, %93, %95 : vector<8x128xf32>
    %97 = arith.subf %93, %95 : vector<8x128xf32>
    %cst_34 = arith.constant 1.000000e+00 : f32
    %98 = vector.broadcast %cst_34 : f32 to vector<8x128xf32>
    %99 = arith.select %96, %98, %93 : vector<8x128xi1>, vector<8x128xf32>
    %100 = tpu.reciprocal %99 {approx = true} : vector<8x128xf32> -> vector<8x128xf32>
    %101 = arith.mulf %97, %100 : vector<8x128xf32>
    %102 = arith.select %96, %98, %97 : vector<8x128xi1>, vector<8x128xf32>
    %103 = tpu.reciprocal %102 {approx = true} : vector<8x128xf32> -> vector<8x128xf32>
    %104 = arith.subf %93, %73 : vector<8x128xf32>
    %105 = arith.mulf %104, %103 : vector<8x128xf32>
    %106 = arith.subf %93, %82 : vector<8x128xf32>
    %107 = arith.mulf %106, %103 : vector<8x128xf32>
    %108 = arith.subf %93, %91 : vector<8x128xf32>
    %109 = arith.mulf %108, %103 : vector<8x128xf32>
    %110 = arith.cmpf oeq, %93, %73 : vector<8x128xf32>
    %111 = arith.cmpf oeq, %93, %82 : vector<8x128xf32>
    %cst_35 = arith.constant dense<true> : vector<8x128xi1>
    %112 = arith.xori %110, %cst_35 : vector<8x128xi1>
    %113 = arith.andi %111, %112 : vector<8x128xi1>
    %cst_36 = arith.constant dense<true> : vector<8x128xi1>
    %114 = arith.xori %110, %cst_36 : vector<8x128xi1>
    %115 = arith.cmpf one, %93, %82 : vector<8x128xf32>
    %116 = arith.andi %114, %115 : vector<8x128xi1>
    %117 = arith.extui %110 : vector<8x128xi1> to vector<8x128xi32>
    %118 = arith.sitofp %117 : vector<8x128xi32> to vector<8x128xf32>
    %119 = arith.subf %109, %107 : vector<8x128xf32>
    %120 = arith.mulf %118, %119 : vector<8x128xf32>
    %121 = arith.extui %113 : vector<8x128xi1> to vector<8x128xi32>
    %122 = arith.sitofp %121 : vector<8x128xi32> to vector<8x128xf32>
    %cst_37 = arith.constant 2.000000e+00 : f32
    %123 = vector.broadcast %cst_37 : f32 to vector<8x128xf32>
    %124 = arith.addf %123, %105 : vector<8x128xf32>
    %125 = arith.subf %124, %109 : vector<8x128xf32>
    %126 = arith.mulf %122, %125 : vector<8x128xf32>
    %127 = arith.extui %116 : vector<8x128xi1> to vector<8x128xi32>
    %128 = arith.sitofp %127 : vector<8x128xi32> to vector<8x128xf32>
    %cst_38 = arith.constant 4.000000e+00 : f32
    %129 = vector.broadcast %cst_38 : f32 to vector<8x128xf32>
    %130 = arith.addf %129, %107 : vector<8x128xf32>
    %131 = arith.subf %130, %105 : vector<8x128xf32>
    %132 = arith.mulf %128, %131 : vector<8x128xf32>
    %133 = arith.addf %120, %126 : vector<8x128xf32>
    %134 = arith.addf %133, %132 : vector<8x128xf32>
    %cst_39 = arith.constant 0.000000e+00 : f32
    %135 = vector.broadcast %cst_39 : f32 to vector<8x128xf32>
    %136 = arith.cmpf olt, %134, %135 : vector<8x128xf32>
    %cst_40 = arith.constant 6.000000e+00 : f32
    %137 = vector.broadcast %cst_40 : f32 to vector<8x128xf32>
    %138 = arith.addf %134, %137 : vector<8x128xf32>
    %139 = arith.select %136, %138, %134 : vector<8x128xi1>, vector<8x128xf32>
    %cst_41 = arith.constant 0.166666672 : f32
    %140 = vector.broadcast %cst_41 : f32 to vector<8x128xf32>
    %141 = arith.mulf %139, %140 : vector<8x128xf32>
    %142 = vector.broadcast %3 : f32 to vector<8x128xf32>
    %143 = arith.addf %141, %142 : vector<8x128xf32>
    %cst_42 = arith.constant 0.000000e+00 : f32
    %144 = vector.broadcast %cst_42 : f32 to vector<8x128xf32>
    %145 = arith.cmpf olt, %143, %144 : vector<8x128xf32>
    %cst_43 = arith.constant 1.000000e+00 : f32
    %146 = vector.broadcast %cst_43 : f32 to vector<8x128xf32>
    %147 = arith.addf %143, %146 : vector<8x128xf32>
    %148 = arith.select %145, %147, %143 : vector<8x128xi1>, vector<8x128xf32>
    %cst_44 = arith.constant 1.000000e+00 : f32
    %149 = vector.broadcast %cst_44 : f32 to vector<8x128xf32>
    %150 = arith.cmpf oge, %148, %149 : vector<8x128xf32>
    %cst_45 = arith.constant 1.000000e+00 : f32
    %151 = vector.broadcast %cst_45 : f32 to vector<8x128xf32>
    %152 = arith.subf %148, %151 : vector<8x128xf32>
    %153 = arith.select %150, %152, %148 : vector<8x128xi1>, vector<8x128xf32>
    %cst_46 = arith.constant 6.000000e+00 : f32
    %154 = vector.broadcast %cst_46 : f32 to vector<8x128xf32>
    %155 = arith.mulf %153, %154 : vector<8x128xf32>
    %156 = math.floor %155 : vector<8x128xf32>
    %cst_47 = arith.constant 0.000000e+00 : f32
    %cst_48 = arith.constant 5.000000e+00 : f32
    %157 = vector.broadcast %cst_47 : f32 to vector<8x128xf32>
    %158 = arith.maximumf %157, %156 : vector<8x128xf32>
    %159 = vector.broadcast %cst_48 : f32 to vector<8x128xf32>
    %160 = arith.minimumf %159, %158 : vector<8x128xf32>
    %161 = arith.subf %155, %160 : vector<8x128xf32>
    %162 = arith.mulf %101, %93 : vector<8x128xf32>
    %163 = arith.subf %93, %162 : vector<8x128xf32>
    %cst_49 = arith.constant 0.000000e+00 : f32
    %cst_50 = arith.constant 1.000000e+00 : f32
    %164 = vector.broadcast %cst_49 : f32 to vector<8x128xf32>
    %165 = arith.maximumf %164, %163 : vector<8x128xf32>
    %166 = vector.broadcast %cst_50 : f32 to vector<8x128xf32>
    %167 = arith.minimumf %166, %165 : vector<8x128xf32>
    %168 = arith.mulf %162, %161 : vector<8x128xf32>
    %169 = arith.subf %93, %168 : vector<8x128xf32>
    %cst_51 = arith.constant 0.000000e+00 : f32
    %cst_52 = arith.constant 1.000000e+00 : f32
    %170 = vector.broadcast %cst_51 : f32 to vector<8x128xf32>
    %171 = arith.maximumf %170, %169 : vector<8x128xf32>
    %172 = vector.broadcast %cst_52 : f32 to vector<8x128xf32>
    %173 = arith.minimumf %172, %171 : vector<8x128xf32>
    %cst_53 = arith.constant 1.000000e+00 : f32
    %174 = vector.broadcast %cst_53 : f32 to vector<8x128xf32>
    %175 = arith.subf %174, %161 : vector<8x128xf32>
    %176 = arith.mulf %162, %175 : vector<8x128xf32>
    %177 = arith.subf %93, %176 : vector<8x128xf32>
    %cst_54 = arith.constant 0.000000e+00 : f32
    %cst_55 = arith.constant 1.000000e+00 : f32
    %178 = vector.broadcast %cst_54 : f32 to vector<8x128xf32>
    %179 = arith.maximumf %178, %177 : vector<8x128xf32>
    %180 = vector.broadcast %cst_55 : f32 to vector<8x128xf32>
    %181 = arith.minimumf %180, %179 : vector<8x128xf32>
    %cst_56 = arith.constant 0.000000e+00 : f32
    %182 = vector.broadcast %cst_56 : f32 to vector<8x128xf32>
    %183 = arith.cmpf oeq, %160, %182 : vector<8x128xf32>
    %184 = arith.extui %183 : vector<8x128xi1> to vector<8x128xi32>
    %185 = arith.sitofp %184 : vector<8x128xi32> to vector<8x128xf32>
    %cst_57 = arith.constant 1.000000e+00 : f32
    %186 = vector.broadcast %cst_57 : f32 to vector<8x128xf32>
    %187 = arith.cmpf oeq, %160, %186 : vector<8x128xf32>
    %188 = arith.extui %187 : vector<8x128xi1> to vector<8x128xi32>
    %189 = arith.sitofp %188 : vector<8x128xi32> to vector<8x128xf32>
    %cst_58 = arith.constant 2.000000e+00 : f32
    %190 = vector.broadcast %cst_58 : f32 to vector<8x128xf32>
    %191 = arith.cmpf oeq, %160, %190 : vector<8x128xf32>
    %192 = arith.extui %191 : vector<8x128xi1> to vector<8x128xi32>
    %193 = arith.sitofp %192 : vector<8x128xi32> to vector<8x128xf32>
    %cst_59 = arith.constant 3.000000e+00 : f32
    %194 = vector.broadcast %cst_59 : f32 to vector<8x128xf32>
    %195 = arith.cmpf oeq, %160, %194 : vector<8x128xf32>
    %196 = arith.extui %195 : vector<8x128xi1> to vector<8x128xi32>
    %197 = arith.sitofp %196 : vector<8x128xi32> to vector<8x128xf32>
    %cst_60 = arith.constant 4.000000e+00 : f32
    %198 = vector.broadcast %cst_60 : f32 to vector<8x128xf32>
    %199 = arith.cmpf oeq, %160, %198 : vector<8x128xf32>
    %200 = arith.extui %199 : vector<8x128xi1> to vector<8x128xi32>
    %201 = arith.sitofp %200 : vector<8x128xi32> to vector<8x128xf32>
    %cst_61 = arith.constant 5.000000e+00 : f32
    %202 = vector.broadcast %cst_61 : f32 to vector<8x128xf32>
    %203 = arith.cmpf oeq, %160, %202 : vector<8x128xf32>
    %204 = arith.extui %203 : vector<8x128xi1> to vector<8x128xi32>
    %205 = arith.sitofp %204 : vector<8x128xi32> to vector<8x128xf32>
    %206 = arith.addf %185, %205 : vector<8x128xf32>
    %207 = arith.mulf %206, %93 : vector<8x128xf32>
    %208 = arith.mulf %189, %173 : vector<8x128xf32>
    %209 = arith.addf %207, %208 : vector<8x128xf32>
    %210 = arith.addf %193, %197 : vector<8x128xf32>
    %211 = arith.mulf %210, %167 : vector<8x128xf32>
    %212 = arith.addf %209, %211 : vector<8x128xf32>
    %213 = arith.mulf %201, %181 : vector<8x128xf32>
    %214 = arith.addf %212, %213 : vector<8x128xf32>
    %215 = arith.addf %189, %193 : vector<8x128xf32>
    %216 = arith.mulf %215, %93 : vector<8x128xf32>
    %217 = arith.mulf %185, %181 : vector<8x128xf32>
    %218 = arith.addf %216, %217 : vector<8x128xf32>
    %219 = arith.mulf %197, %173 : vector<8x128xf32>
    %220 = arith.addf %218, %219 : vector<8x128xf32>
    %221 = arith.addf %201, %205 : vector<8x128xf32>
    %222 = arith.mulf %221, %167 : vector<8x128xf32>
    %223 = arith.addf %220, %222 : vector<8x128xf32>
    %224 = arith.addf %201, %205 : vector<8x128xf32>
    %225 = arith.mulf %224, %93 : vector<8x128xf32>
    %226 = arith.addf %185, %189 : vector<8x128xf32>
    %227 = arith.mulf %226, %167 : vector<8x128xf32>
    %228 = arith.addf %225, %227 : vector<8x128xf32>
    %229 = arith.addf %193, %197 : vector<8x128xf32>
    %230 = arith.mulf %229, %181 : vector<8x128xf32>
    %231 = arith.addf %228, %230 : vector<8x128xf32>
    %c0_62 = arith.constant 0 : index
    %c0_63 = arith.constant 0 : index
    %c0_64 = arith.constant 0 : index
    %c0_65 = arith.constant 0 : index
    %232 = vector.load %arg5[%c0_62, %c0_63, %c0_64, %c0_65] : memref<1x3x8x128xf32, #tpu.memory_space<vmem>>, vector<1x1x8x128xf32>
    %233 = vector.shape_cast %232 : vector<1x1x8x128xf32> to vector<8x128xf32>
    %234 = vector.shape_cast %214 : vector<8x128xf32> to vector<1x1x8x128xf32>
    tpu.vector_store %arg5[%c0_62, %c0_63, %c0_64, %c0_65], %234 {strides = array<i32>} : memref<1x3x8x128xf32, #tpu.memory_space<vmem>>, vector<1x1x8x128xf32>,
    %c0_66 = arith.constant 0 : index
    %c1_67 = arith.constant 1 : index
    %c0_68 = arith.constant 0 : index
    %c0_69 = arith.constant 0 : index
    %235 = vector.load %arg5[%c0_66, %c1_67, %c0_68, %c0_69] : memref<1x3x8x128xf32, #tpu.memory_space<vmem>>, vector<1x1x8x128xf32>
    %236 = vector.shape_cast %235 : vector<1x1x8x128xf32> to vector<8x128xf32>
    %237 = vector.shape_cast %223 : vector<8x128xf32> to vector<1x1x8x128xf32>
    tpu.vector_store %arg5[%c0_66, %c1_67, %c0_68, %c0_69], %237 {strides = array<i32>} : memref<1x3x8x128xf32, #tpu.memory_space<vmem>>, vector<1x1x8x128xf32>,
    %c0_70 = arith.constant 0 : index
    %c2_71 = arith.constant 2 : index
    %c0_72 = arith.constant 0 : index
    %c0_73 = arith.constant 0 : index
    %238 = vector.load %arg5[%c0_70, %c2_71, %c0_72, %c0_73] : memref<1x3x8x128xf32, #tpu.memory_space<vmem>>, vector<1x1x8x128xf32>
    %239 = vector.shape_cast %238 : vector<1x1x8x128xf32> to vector<8x128xf32>
    %240 = vector.shape_cast %231 : vector<8x128xf32> to vector<1x1x8x128xf32>
    tpu.vector_store %arg5[%c0_70, %c2_71, %c0_72, %c0_73], %240 {strides = array<i32>} : memref<1x3x8x128xf32, #tpu.memory_space<vmem>>, vector<1x1x8x128xf32>,
    return
  }
  func.func @transform_0(%arg0: i32, %arg1: i32) -> i32 {
    %c0_i32 = arith.constant 0 : i32
    %c0_i32_0 = arith.constant 0 : i32
    return %c0_i32 : i32
  }
  func.func @transform_1(%arg0: i32, %arg1: i32) -> i32 {
    %c0_i32 = arith.constant 0 : i32
    %c0_i32_0 = arith.constant 0 : i32
    return %c0_i32 : i32
  }
  func.func @transform_2(%arg0: i32, %arg1: i32) -> (i32, i32, i32, i32) {
    %c0_i32 = arith.constant 0 : i32
    %c0_i32_0 = arith.constant 0 : i32
    %c0_i32_1 = arith.constant 0 : i32
    return %arg0, %c0_i32, %arg1, %c0_i32_0 : i32, i32, i32, i32
  }
  func.func @transform_3(%arg0: i32, %arg1: i32) -> (i32, i32, i32, i32) {
    %c0_i32 = arith.constant 0 : i32
    %c0_i32_0 = arith.constant 0 : i32
    %c0_i32_1 = arith.constant 0 : i32
    return %arg0, %c0_i32, %arg1, %c0_i32_0 : i32, i32, i32, i32
  }
}

</mosaic_0001>

<bundles_post_ra>
// kernel: tpu_custom_call.1
= control target key start
LH: loop header
LB: loop body
LE: loop exit
PB: predicated region body
PF: predicated region fallthrough
CT: control target
= control target key end

     0   :  { %8 = vsyncpa [#allocation5], 0  ;;  %s1084_s0 = inlined_call_operand.hbm [shape: f32[4], index: 0, kind: input, shape index: {}]   ;;  %s1085_s1 = inlined_call_operand.vmem [shape: f32[2], index: 1, kind: input, shape index: {}]   ;;  %s1086_s2 = inlined_call_operand.hbm [shape: f32[2,3,8,128], index: 2, kind: input, shape index: {}]   ;;  %s1087_s3 = inlined_call_operand.hbm [shape: f32[2,3,8,128], index: 3, kind: output, shape index: {}]  }
   0x1   :  { %9 = vsyncpa [#allocation6], 0 }
   0x2   :  { %10 = vsyncpa [#allocation3], 0 }
   0x3   :  { %12 = vsyncpa [#allocation3 + $0x1], 0 }
   0x4   :  { %13 = vsyncpa [#allocation4], 0 }
   0x5   :  { %15 = vsyncpa [#allocation4 + $0x1], 0  ;;  %s835_s12 = smov 0   ;;  %s837_s13 = smov 0  }
   0x6   :  { %s839_s14 = smov 0   ;;  %s841_s15 = smov 0  }
   0x7   :  { %s843_s16 = smov 0   ;;  %s845_s17 = smov 0  }
   0x8 LB: > { %s528_s18 = sadd.s32 4294967295, %s803_s17   ;;  %s529_s19 = sadd.s32 4294967294, %s803_s17   ;;  %s803_s17 = sphi %s845_s17, %s21_s17   ;;  %s799_s16 = sphi %s843_s16, %s1108_s16   ;;  %s795_s15 = sphi %s841_s15, %s1107_s15   ;;  %s791_s14 = sphi %s839_s14, %s1106_s14   ;;  %s787_s13 = sphi %s837_s13, %s1105_s13   ;;  %s783_s12 = sphi %s835_s12, %s1104_s12  }
   0x9   : > { %s84_s20 = sadd.s32 1, %s791_s14  ;;  %p91_p0 = scmp.ne.s32.totalorder %s791_s14, %s787_s13 }
   0xa   : > { %p92_p1 = scmp.eq.s32.totalorder %s803_s17, 0  ;;  %p97_p2 = scmp.ne.s32.totalorder %s787_s13, %s783_s12 }
   0xb   : > { %p873_p3 = scmp.eq.s32.totalorder %s528_s18, 0  ;;  %p123_p4 = scmp.eq.s32.totalorder %s528_s18, 1 }
   0xc   : > { %p93_p5 = por %p92_p1, %p91_p0  ;;  %p129_p6 = scmp.eq.s32.totalorder %s529_s19, 1 }
   0xd   : > { %s1092_s21 = scalar_select %p873_p3, 1, 0 }
   0xe   : > { %p879_p7 = por %p873_p3, %p97_p2  ;;  %p883_p8 = por %p123_p4, %p91_p0 }
   0xf   : > { %p887_p9 = por %p129_p6, %p97_p2  ;;  %p530_p10 = scmp.ge.s32.totalorder %s803_s17, 1 }
  0x10   : > { %s1093_s22 = scalar_select %p879_p7, 1, 0 }
  0x11   : > { %s1094_s23 = scalar_select %p883_p8, 1, 0 }
  0x12   : > { %s1095_s24 = scalar_select %p887_p9, 1, 0 }
  0x13   : > { %p136_p11 = scmp.lt.s32.totalorder %s803_s17, 3  ;;  %p591_p1 = scmp.lt.s32.totalorder %s803_s17, 2 }
  0x14   : > { %s158_s28 = sshll.u32 %s1085_s1, 4  ;;  %s169_s4 = sand.u32 1, %s791_s14   ;;  %s159_s28 = int_to_ptr.vmem [resolvable:$true] %s158_s28 }
  0x15   : > { %p894_p13 = pnand %p530_p10, %p136_p11  ;;  %p904_p4 = pnand %p591_p1, %p93_p5 }
  0x16   : > { %s33_s5 = sadd.s32 1, %s799_s16  ;;  %s655_s8 = scalar_lea.hbm %s1084_s0, 16 }
  0x17   : > { %p574_p0 = pneg %p894_p13  ;;  %p656_p5 = scmp.ne.s32.totalorder %s1084_s0, %s655_s8 }
  0x18   : > { %p662_p1 = scmp.lt.u32.totalorder %s655_s8, %s1084_s0 }
  0x19   : > { %p910_p2 = pnand %p574_p0, %p873_p3 }
  0x1b   : > { %p657_p6 = pneg %p910_p2 }
  0x1d   : > { %p658_p10 = pnand %p657_p6, %p656_p5 }
  0x1f   : > { %p659_p11 = pneg %p658_p10 }
  0x21   : > { %p664_p0 = pnand %p662_p1, %p659_p11 }
  0x23   : > { %667 = shalt.err (!%p664_p0)
}
  0x24   : > { %s805_s19 = smov [#allocation2]   ;;  %s668_s6 = scalar_lea.vmem %s159_s28, 16 }
  0x25   : > { %577 = dma.hbm_to_smem (!%p910_p2), %s1084_s0, 16, %s805_s19, [#allocation5]  }
  0x26   : > { %p669_p12 = scmp.ne.s32.totalorder %s159_s28, %s668_s6  ;;  %p676_p7 = scmp.lt.s32.totalorder %s159_s28, %s159_s28 }
  0x27   : > { %p677_p5 = scmp.lt.s32.totalorder %s668_s6, %s668_s6 }
  0x28   : > { %p671_p9 = pnand %p669_p12, %p657_p6 }
  0x29   : > { %p678_p10 = por %p677_p5, %p676_p7 }
  0x2a   : > { %p672_p8 = pneg %p671_p9 }
  0x2c   : > { %p679_p3 = pnand %p678_p10, %p672_p8 }
  0x2e   : > { %682 = shalt.err (!%p679_p3)
}
  0x2f   : > { %s806_s7 = smov [#allocation7]   ;;  %p35_p11 = scmp.ge.s32.totalorder %s33_s5, 2 }
  0x30   : > { %580 = dma.vmem_to_smem (!%p910_p2), %s159_s28, 16, %s806_s7, [#allocation6]  }
  0x31   : > { %s558_s8 = smul.u32 24, %s169_s4  ;;  %s1110_s5 = smov (%p35_p11, %s33_s5), 0 }
  0x32   : > { %s559_s9 = smul.u32 384, %s799_s16  ;;  %s79_s10 = ssub.s32 %s799_s16, %s1110_s5 }
  0x33   : > { %s173_s11 = scalar_lea.vmem [#allocation8], %s558_s8  ;;  %p82_p3 = scmp.eq.s32.totalorder %s79_s10, 0 }
  0x34   : > { %s181_s18 = sshll.u32 %s173_s11, 4  ;;  %s944_s26 = scalar_lea.hbm %s1086_s2, %s559_s9  ;;  %s946_s18 = int_to_ptr.vmem [resolvable:$true] %s181_s18 }
  0x35   : > { %s951_s28 = scalar_select %p82_p3, %s791_s14, %s84_s20  }
  0x36   : > { %s955_s27 = scalar_lea.sflag [#allocation3], %s169_s4  ;;  %s683_s6 = scalar_lea.hbm %s944_s26, 384 }
  0x37   : > { %p684_p7 = scmp.ne.s32.totalorder %s944_s26, %s683_s6  ;;  %p685_p8 = pneg %p904_p4 }
  0x38   : > { %s688_s9 = scalar_lea.hbm %s1086_s2, 768  ;;  %p689_p2 = scmp.lt.u32.totalorder %s944_s26, %s1086_s2 }
  0x39   : > { %p686_p9 = pnand %p685_p8, %p684_p7  ;;  %p690_p6 = scmp.lt.u32.totalorder %s688_s9, %s683_s6 }
  0x3a   : > { %p692_p0 = scmp.lt.u32.totalorder %s683_s6, %s944_s26 }
  0x3b   : > { %p687_p12 = pneg %p686_p9  ;;  %p691_p1 = por %p690_p6, %p689_p2 }
  0x3d   : > { %p693_p5 = por %p692_p0, %p691_p1 }
  0x3f   : > { %p694_p10 = pnand %p693_p5, %p687_p12 }
  0x41   : > { %697 = shalt.err (!%p694_p10)
}
  0x42   : > { %s698_s20 = scalar_lea.vmem %s946_s18, 384  ;;  %s807_s4 = smov [#allocation8]  }
  0x43   : > { %p699_p11 = scmp.ne.s32.totalorder %s946_s18, %s698_s20  ;;  %s703_s30 = sshll.u32 %s807_s4, 4  ;;  %s704_s30 = int_to_ptr.vmem [resolvable:$false] %s703_s30 }
  0x44   : > { %s705_s19 = scalar_lea.vmem %s704_s30, 768  ;;  %p706_p9 = scmp.lt.s32.totalorder %s946_s18, %s704_s30 }
  0x45   : > { %p701_p3 = pnand %p699_p11, %p685_p8  ;;  %p707_p2 = scmp.lt.s32.totalorder %s705_s19, %s698_s20 }
  0x47   : > { %p702_p7 = pneg %p701_p3  ;;  %p708_p6 = por %p707_p2, %p706_p9 }
  0x49   : > { %p709_p1 = pnand %p708_p6, %p702_p7 }
  0x4b   : > { %712 = shalt.err (!%p709_p1)
}
  0x4c   : > { %s808_s6 = smov 128   ;;  %s809_s7 = smov 8  }
  0x4d   : > { %584 = dma.hbm_to_vmem [thread:$0]  (!%p904_p4), %s944_s26, 384, %s946_s18, %s955_s27, %s808_s6, %s808_s6, %s809_s7  }
  0x4e   : > { %193 = sbr.rel (%p894_p13) target bundleno = 216 (0xd8), region = 32  ;;  %p1099_p8 = scmp.ne.s32.totalorder (!%p894_p13), %s1092_s21, 0 }
  0x55   : > { %766 = dma.done.wait (%p1099_p8), [#allocation5], 16  }
  0x56   : > { %768 = vsyncadd (%p1099_p8), [#allocation5], 4294967280 }
  0x57   : > { %770 = dma.done.wait (%p1099_p8), [#allocation6], 16  }
  0x58   : > { %772 = vsyncadd (%p1099_p8), [#allocation6], 4294967280  ;;  %s994_s8 = sand.u32 1, %s787_s13   ;;  %p1100_p13 = scmp.ne.s32.totalorder %s1093_s22, 0 }
  0x59   : > { %s560_s25 = smul.u32 24, %s994_s8  ;;  %s204_s29 = scalar_lea.sflag [#allocation3], %s994_s8 }
  0x5b   : > { %s207_s18 = scalar_lea.vmem [#allocation8], %s560_s25 }
  0x5c   : > { %774 = dma.done.wait (%p1100_p13), %s204_s29, 384  }
  0x5d   : > { %776 = vsyncadd (%p1100_p13), %s204_s29, 4294966912 }
  0x5e   : > { %212 = sfence }
  0x5f   : > { %s231_s26 = sld [smem:[#allocation2]]  ;;  %s538_s21 = sld [smem:[#allocation2 + $0x1]]  ;;  %v236_v0 = vld [vmem:[%s207_s18] sm:$0xff]  ;;  %v541_v1 = vld [vmem:[%s207_s18 + $0x8] sm:$0xff]  ;;  %v542_v2 = vld [vmem:[%s207_s18 + $0x10] sm:$0xff]  ;;  %vm810_vm3 = vmmov 1  }
  0x60   : > { %s235_s27 = sld [smem:[#allocation7 + %s795_s15]]  ;;  %v811_v60 = vmov 0.0   ;;  %s230_s4 = scalar_lea.vmem [#allocation9], %s560_s25 }
  0x61   : > { %s539_s22 = sld [smem:[#allocation2 + $0x2]]  ;;  %s540_s20 = sld [smem:[#allocation2 + $0x3]] }
  0x62   : > { %s419_s30 = sshll.u32 %s230_s4, 4  ;;  %s561_s19 = smul.u32 384, %s795_s15  ;;  %s1030_s30 = int_to_ptr.vmem [resolvable:$true] %s419_s30 }
  0x63   : > { %s405_s29 = scalar_lea.sflag [#allocation4], %s994_s8  ;;  %s713_s18 = scalar_lea.vmem %s1030_s30, 384 }
  0x64   : > { %s1035_s25 = scalar_lea.hbm %s1087_s3, %s561_s19  ;;  %p714_p4 = scmp.ne.s32.totalorder %s1030_s30, %s713_s18 }
  0x65   : > { %v241_v3 = vstv %s231_s26  ;;  %s251_s9 = ssub.f32 1.0, %s538_s21  ;;  %v253_v10 = vstv %s538_s21  ;;  %p1101_p12 = scmp.ne.s32.totalorder %s1094_s23, 0 }
  0x66   : > { %v242_v4 = vmul.f32 %v241_v3, %v236_v0  ;;  %v245_v5 = vmul.f32 %v541_v1, %v241_v3  ;;  %v248_v6 = vmul.f32 %v542_v2, %v241_v3  ;;  %s812_s15 = smov [#allocation9]  }
  0x67   : > { %s252_s10 = smul.f32 %s251_s9, %s235_s27  ;;  %s272_s11 = ssub.f32 1.0, %s539_s22  ;;  %v273_v30 = vstv %s539_s22 }
  0x68   : > { %v243_v7 = vmax.f32 %v242_v4, 0.0  ;;  %v246_v8 = vmax.f32 %v245_v5, 0.0  ;;  %v249_v9 = vmax.f32 %v248_v6, 0.0  ;;  %p715_p0 = pnand %p714_p4, %p1101_p12  ;;  %s717_s26 = sshll.u32 %s812_s15, 4  ;;  %s718_s26 = int_to_ptr.vmem [resolvable:$false] %s717_s26 }
  0x69   : > { %v255_v14 = vstv %s252_s10  ;;  %v275_v32 = vstv %s272_s11  ;;  %s719_s21 = scalar_lea.vmem %s718_s26, 768  ;;  %p720_p10 = scmp.lt.s32.totalorder %s1030_s30, %s718_s26 }
  0x6a   : > { %v244_v11 = vmin.f32 %v243_v7, 1.0  ;;  %v247_v12 = vmin.f32 %v246_v8, 1.0  ;;  %v250_v13 = vmin.f32 %v249_v9, 1.0  ;;  %p716_p5 = pneg %p715_p0  ;;  %p721_p11 = scmp.lt.s32.totalorder %s719_s21, %s713_s18 }
  0x6c   : > { %v254_v15 = vmul.f32 %v253_v10, %v244_v11  ;;  %v259_v16 = vmul.f32 %v253_v10, %v247_v12  ;;  %v263_v17 = vmul.f32 %v253_v10, %v250_v13  ;;  %v331_v13 = vstv %s540_s20  ;;  %p722_p3 = por %p721_p11, %p720_p10 }
  0x6e   : > { %v256_v18 = vadd.f32 %v255_v14, %v254_v15  ;;  %v260_v19 = vadd.f32 %v259_v16, %v255_v14  ;;  %v264_v20 = vadd.f32 %v263_v17, %v255_v14  ;;  %p723_p7 = pnand %p722_p3, %p716_p5 }
  0x70   : > { %v257_v21 = vmax.f32 %v256_v18, 0.0  ;;  %v261_v22 = vmax.f32 %v260_v19, 0.0  ;;  %v265_v23 = vmax.f32 %v264_v20, 0.0 }
  0x72   : > { %v258_v24 = vmin.f32 %v257_v21, 1.0  ;;  %v262_v25 = vmin.f32 %v261_v22, 1.0  ;;  %v266_v26 = vmin.f32 %v265_v23, 1.0 }
  0x74   : > { %v267_v27 = vmul.f32 0.2989, %v258_v24  ;;  %v268_v28 = vmul.f32 0.587, %v262_v25  ;;  %v270_v29 = vmul.f32 0.114, %v266_v26  ;;  %v274_v34 = vmul.f32 %v273_v30, %v258_v24 }
  0x75   : > { %v280_v35 = vmul.f32 %v273_v30, %v262_v25  ;;  %v284_v36 = vmul.f32 %v273_v30, %v266_v26 }
  0x76   : > { %v269_v31 = vadd.f32 %v268_v28, %v267_v27 }
  0x78   : > { %v271_v33 = vadd.f32 %v270_v29, %v269_v31 }
  0x7a   : > { %v276_v37 = vmul.f32 %v275_v32, %v271_v33 }
  0x7c   : > { %v277_v38 = vadd.f32 %v276_v37, %v274_v34  ;;  %v281_v39 = vadd.f32 %v280_v35, %v276_v37  ;;  %v285_v40 = vadd.f32 %v284_v36, %v276_v37 }
  0x7e   : > { %v278_v41 = vmax.f32 %v277_v38, 0.0  ;;  %v282_v42 = vmax.f32 %v281_v39, 0.0  ;;  %v286_v43 = vmax.f32 %v285_v40, 0.0 }
  0x80   : > { %v279_v44 = vmin.f32 %v278_v41, 1.0  ;;  %v283_v45 = vmin.f32 %v282_v42, 1.0  ;;  %v287_v46 = vmin.f32 %v286_v43, 1.0 }
  0x82   : > { %v288_v47 = vmax.f32 %v279_v44, %v283_v45  ;;  %v290_v48 = vmin.f32 %v279_v44, %v283_v45 }
  0x84   : > { %v1005_v49 = vmax.f32 %v288_v47, %v287_v46  ;;  %v291_v50 = vmin.f32 %v290_v48, %v287_v46 }
  0x86   : > { %vm292_vm0 = vcmp.eq.f32.partialorder %v1005_v49, %v291_v50  ;;  %v293_v51 = vsub.f32 %v1005_v49, %v291_v50  ;;  %vm305_vm1 = vcmp.eq.f32.partialorder %v1005_v49, %v279_v44  ;;  %v299_v53 = vsub.f32 %v1005_v49, %v279_v44 }
  0x87   : > { %v301_v54 = vsub.f32 %v1005_v49, %v283_v45  ;;  %v303_v55 = vsub.f32 %v1005_v49, %v287_v46  ;;  %vm306_vm2 = vcmp.eq.f32.partialorder %v1005_v49, %v283_v45  ;;  %vm307_vm4 = vmxor %vm305_vm1, %vm810_vm3  ;;  %vm309_vm5 = vcmp.ne.f32.partialorder %v1005_v49, %v283_v45 }
  0x88   : > { %v297_v52 = vsel %vm292_vm0, 1.0, %v293_v51  ;;  %vm308_vm6 = vmand %vm306_vm2, %vm307_vm4  ;;  %v543_v61 = vsel %vm305_vm1, 1.0, %v811_v60  ;;  %v294_v3 = vsel %vm292_vm0, 1.0, %v1005_v49 }
  0x89   : > { %651 = vrcp.f32 %v297_v52  ;;  %vm310_vm7 = vmand %vm307_vm4, %vm309_vm5  ;;  %v544_v1 = vsel %vm308_vm6, 1.0, %v811_v60 }
  0x8a   : > { %v545_v2 = vsel %vm310_vm7, 1.0, %v811_v60  ;;  %653 = vrcp.f32 %v294_v3 }
  0x93   : > { %v652_v56 = vpop.eup %651 }
  0x94   : > { %v300_v57 = vmul.f32 %v652_v56, %v299_v53  ;;  %v302_v58 = vmul.f32 %v652_v56, %v301_v54  ;;  %v304_v59 = vmul.f32 %v652_v56, %v303_v55  ;;  %v654_v15 = vpop.eup %653 }
  0x95   : > { %v296_v18 = vmul.f32 %v654_v15, %v293_v51 }
  0x96   : > { %v313_v62 = vsub.f32 %v304_v59, %v302_v58  ;;  %v317_v63 = vadd.f32 2.0, %v300_v57  ;;  %v322_v0 = vadd.f32 4.0, %v302_v58 }
  0x97   : > { %v344_v22 = vmul.f32 %v296_v18, %v1005_v49 }
  0x98   : > { %v314_v4 = vmul.f32 %v543_v61, %v313_v62  ;;  %v318_v5 = vsub.f32 %v317_v63, %v304_v59  ;;  %v323_v6 = vsub.f32 %v322_v0, %v300_v57 }
  0x99   : > { %v345_v24 = vsub.f32 %v1005_v49, %v344_v22 }
  0x9a   : > { %v319_v7 = vmul.f32 %v544_v1, %v318_v5  ;;  %v324_v8 = vmul.f32 %v545_v2, %v323_v6 }
  0x9b   : > { %v346_v27 = vmax.f32 %v345_v24, 0.0 }
  0x9c   : > { %v325_v9 = vadd.f32 %v319_v7, %v314_v4 }
  0x9d   : > { %v347_v30 = vmin.f32 %v346_v27, 1.0 }
  0x9e   : > { %v326_v10 = vadd.f32 %v325_v9, %v324_v8 }
  0xa0   : > { %vm327_vm8 = vcmp.lt.f32.partialorder %v326_v10, 0.0  ;;  %v328_v11 = vadd.f32 6.0, %v326_v10 }
  0xa2   : > { %v329_v12 = vsel %vm327_vm8, %v328_v11, %v326_v10 }
  0xa3   : > { %v330_v14 = vmul.f32 0.16666667, %v329_v12 }
  0xa5   : > { %v332_v16 = vadd.f32 %v331_v13, %v330_v14 }
  0xa7   : > { %vm333_vm9 = vcmp.lt.f32.partialorder %v332_v16, 0.0  ;;  %v334_v17 = vadd.f32 1.0, %v332_v16 }
  0xa9   : > { %v335_v19 = vsel %vm333_vm9, %v334_v17, %v332_v16 }
  0xaa   : > { %vm336_vm10 = vcmp.ge.f32.partialorder %v335_v19, 1.0  ;;  %v546_v20 = vadd.f32 -1.0, %v335_v19 }
  0xac   : > { %v338_v21 = vsel %vm336_vm10, %v546_v20, %v335_v19 }
  0xad   : > { %v339_v23 = vmul.f32 6.0, %v338_v21 }
  0xaf   : > { %v340_v25 = vfloor.f32 %v339_v23 }
  0xb1   : > { %v341_v26 = vmax.f32 %v340_v25, 0.0 }
  0xb3   : > { %v342_v28 = vmin.f32 %v341_v26, 5.0 }
  0xb5   : > { %v343_v29 = vsub.f32 %v339_v23, %v342_v28  ;;  %vm357_vm11 = vcmp.eq.f32.partialorder %v342_v28, 0.0  ;;  %vm360_vm12 = vcmp.eq.f32.partialorder %v342_v28, 1.0  ;;  %vm363_vm13 = vcmp.eq.f32.partialorder %v342_v28, 2.0 }
  0xb6   : > { %v547_v31 = vsel %vm357_vm11, 1.0, %v811_v60  ;;  %vm366_vm14 = vcmp.eq.f32.partialorder %v342_v28, 3.0  ;;  %vm369_vm15 = vcmp.eq.f32.partialorder %v342_v28, 4.0  ;;  %v548_v35 = vsel %vm360_vm12, 1.0, %v811_v60 }
  0xb7   : > { %v348_v32 = vmul.f32 %v344_v22, %v343_v29  ;;  %v352_v33 = vsub.f32 1.0, %v343_v29  ;;  %v550_v34 = vsel %vm366_vm14, 1.0, %v811_v60  ;;  %v549_v36 = vsel %vm363_vm13, 1.0, %v811_v60 }
  0xb8   : > { %v551_v37 = vsel %vm369_vm15, 1.0, %v811_v60  ;;  %vm372_vm0 = vcmp.eq.f32.partialorder %v342_v28, 5.0  ;;  %v394_v41 = vadd.f32 %v548_v35, %v547_v31  ;;  %v379_v43 = vadd.f32 %v550_v34, %v549_v36 }
  0xb9   : > { %v349_v38 = vsub.f32 %v1005_v49, %v348_v32  ;;  %v353_v39 = vmul.f32 %v352_v33, %v344_v22  ;;  %v552_v40 = vsel %vm372_vm0, 1.0, %v811_v60  ;;  %v384_v47 = vadd.f32 %v549_v36, %v548_v35 }
  0xba   : > { %v375_v42 = vadd.f32 %v552_v40, %v547_v31  ;;  %v390_v44 = vadd.f32 %v552_v40, %v551_v37  ;;  %v395_v48 = vmul.f32 %v394_v41, %v347_v30  ;;  %v380_v54 = vmul.f32 %v379_v43, %v347_v30 }
  0xbb   : > { %v350_v45 = vmax.f32 %v349_v38, 0.0  ;;  %v354_v46 = vsub.f32 %v1005_v49, %v353_v39  ;;  %v385_v57 = vmul.f32 %v384_v47, %v1005_v49 }
  0xbc   : > { %v393_v50 = vmul.f32 %v390_v44, %v1005_v49  ;;  %v376_v53 = vmul.f32 %v375_v42, %v1005_v49  ;;  %v391_v2 = vmul.f32 %v390_v44, %v347_v30 }
  0xbd   : > { %v351_v51 = vmin.f32 %v350_v45, 1.0  ;;  %v355_v52 = vmax.f32 %v354_v46, 0.0 }
  0xbe   : > { %v396_v58 = vadd.f32 %v395_v48, %v393_v50 }
  0xbf   : > { %v356_v55 = vmin.f32 %v355_v52, 1.0  ;;  %v377_v56 = vmul.f32 %v548_v35, %v351_v51  ;;  %v388_v59 = vmul.f32 %v550_v34, %v351_v51 }
  0xc1   : > { %v378_v60 = vadd.f32 %v377_v56, %v376_v53  ;;  %v382_v61 = vmul.f32 %v551_v37, %v356_v55  ;;  %v386_v62 = vmul.f32 %v547_v31, %v356_v55  ;;  %v397_v63 = vmul.f32 %v379_v43, %v356_v55 }
  0xc3   : > { %v381_v0 = vadd.f32 %v380_v54, %v378_v60  ;;  %v387_v1 = vadd.f32 %v386_v62, %v385_v57  ;;  %v398_v3 = vadd.f32 %v397_v63, %v396_v58 }
  0xc5   : > { %v383_v4 = vadd.f32 %v382_v61, %v381_v0  ;;  %v389_v5 = vadd.f32 %v388_v59, %v387_v1  ;;  %554 = vst [vmem:[%s230_s4 + $0x10] sm:$0xff] %v398_v3 }
  0xc7   : > { %399 = vst [vmem:[%s230_s4] sm:$0xff] %v383_v4  ;;  %v392_v49 = vadd.f32 %v391_v2, %v389_v5 }
  0xc9   : > { %553 = vst [vmem:[%s230_s4 + $0x8] sm:$0xff] %v392_v49 }
  0xca   : > { %726 = shalt.err (!%p723_p7)
}
  0xcb   : > { %s727_s27 = scalar_lea.hbm %s1035_s25, 384  ;;  %s731_s22 = scalar_lea.hbm %s1087_s3, 768 }
  0xcc   : > { %p728_p9 = scmp.ne.s32.totalorder %s1035_s25, %s727_s27  ;;  %p732_p1 = scmp.lt.u32.totalorder %s1035_s25, %s1087_s3 }
  0xcd   : > { %p733_p8 = scmp.lt.u32.totalorder %s731_s22, %s727_s27  ;;  %p735_p4 = scmp.lt.u32.totalorder %s727_s27, %s1035_s25 }
  0xce   : > { %p729_p2 = pnand %p728_p9, %p1101_p12 }
  0xcf   : > { %p734_p13 = por %p733_p8, %p732_p1 }
  0xd0   : > { %p730_p6 = pneg %p729_p2 }
  0xd1   : > { %p736_p0 = por %p735_p4, %p734_p13 }
  0xd3   : > { %p737_p5 = pnand %p736_p0, %p730_p6 }
  0xd5   : > { %740 = shalt.err (!%p737_p5)
}
  0xd6   : > { %s813_s4 = smov 128   ;;  %s814_s19 = smov 8  }
  0xd7   : > { %572 = dma.vmem_to_hbm [thread:$0]  (%p1101_p12), %s1030_s30, 384, %s1035_s25, %s405_s29, %s813_s4, %s813_s4, %s814_s19  }
  0xd8 PF: > { %s434_s6 = sand.u32 1, %s783_s12   ;;  %p1102_p10 = scmp.ne.s32.totalorder %s1095_s24, 0 }
  0xd9   : > { %p1103_p11 = scmp.ge.s32.totalorder %s803_s17, 2  ;;  %s435_s7 = scalar_lea.sflag [#allocation4], %s434_s6 }
  0xdb   : > { %p586_p3 = pnand %p1103_p11, %p1102_p10 }
  0xdd   : > { %778 = dma.done.wait (!%p586_p3), %s435_s7, 384  }
  0xde   : > { %780 = vsyncadd (!%p586_p3), %s435_s7, 4294966912  ;;  %s21_s17 = sadd.s32 1, %s803_s17   ;;  %s1104_s12 = smov %s787_s13 }
  0xdf   : > { %p18_p7 = scmp.ge.s32.totalorder %s21_s17, 4   ;;  %s1105_s13 = smov %s791_s14 }
  0xe0   : > { %s1106_s14 = smov %s951_s28  ;;  %s1107_s15 = smov %s799_s16 }
  0xe1   : > { %s1108_s16 = smov %s1110_s5  ;;  %20 = sbr.rel (!%p18_p7) target bundleno = 8 (0x8), region = 91 }
  0xe8   :  { %440 = vsyncpa [#allocation3], 1 }
  0xe9   :  { %442 = vsyncpa [#allocation3 + $0x1], 1 }
  0xea   :  { %443 = vsyncpa [#allocation4], 1 }
  0xeb   :  { %445 = vsyncpa [#allocation4 + $0x1], 1 }
  0xec   :  { %446 = vsyncpa [#allocation5], 1 }
  0xed   :  { %448 = vsyncpa [#allocation5 + $0x1], 1 }
  0xee   :  { %449 = vsyncpa [#allocation6], 1 }
  0xef   :  { %451 = vsyncpa [#allocation6 + $0x1], 1 }

</bundles_post_ra>
